<compile_context>
chip_gen: v6e
topology: v6e:2x2x1
jax: 0.10.0
libtpu: 0.0.40
codegen_flags: <defaults>
</compile_context>

<pallas_src>
import functools

import jax
import jax.numpy as jnp
from jax import lax
from jax.experimental import pallas as pl
from jax.experimental.pallas import tpu as pltpu

# Large finite negative instead of -inf: avoids exp(-inf - (-inf)) = NaN if this kernel
# is ever reused with padding masks; identical result for causal masking.
_NEG_INF = -1.0e30

# Scoped VMEM request: sized for <=128x128 tiles with double buffering; raises the
# 16/32 MiB defaults while leaving headroom on v7x (64 MiB physical).
_VMEM_LIMIT_BYTES = 32 * 1024 * 1024


def _pick_block(dim, target):
    """Largest multiple-of-8 divisor of `dim` that is <= target (or the full dim)."""
    if dim <= target:
        return dim
    start = (target // 8) * 8
    for cand in range(start, 7, -8):
        if dim % cand == 0:
            return cand
    return dim


# ---------------------------------------------------------------------------
# Tiled linear kernels (fused QKV projection and the output projection).
# Weights are small relative to VMEM, so only the row (token) axis is tiled.
# ---------------------------------------------------------------------------
def _linear_nobias_kernel(x_ref, w_ref, o_ref):
    o_ref[...] = jnp.dot(
        x_ref[...], w_ref[...], preferred_element_type=jnp.float32
    ).astype(o_ref.dtype)


def _linear_bias_kernel(x_ref, w_ref, b_ref, o_ref):
    acc = jnp.dot(x_ref[...], w_ref[...], preferred_element_type=jnp.float32)
    o_ref[...] = (acc + b_ref[...].astype(jnp.float32)).astype(o_ref.dtype)


def _linear(x, w, bias=None, *, block_rows=256):
    """y = x @ w (+ bias).  x: (..., K), w: (K, N), bias: (N,) or None."""
    *lead, K = x.shape
    N = w.shape[1]
    rows = 1
    for d in lead:
        rows *= d
    x2 = x.reshape(rows, K)

    tr = _pick_block(rows, block_rows)
    grid = (rows // tr,)

    in_specs = [
        pl.BlockSpec((tr, K), lambda i: (i, 0)),      # row tile of activations
        pl.BlockSpec((K, N), lambda i: (0, 0)),       # full weight, VMEM-resident
    ]
    operands = [x2, w]
    if bias is not None:
        in_specs.append(pl.BlockSpec((1, N), lambda i: (0, 0)))
        operands.append(bias.reshape(1, N))
        kernel = _linear_bias_kernel
    else:
        kernel = _linear_nobias_kernel

    y = pl.pallas_call(
        kernel,
        out_shape=jax.ShapeDtypeStruct((rows, N), x.dtype),
        grid_spec=pltpu.PrefetchScalarGridSpec(
            num_scalar_prefetch=0,
            grid=grid,
            in_specs=in_specs,
            out_specs=pl.BlockSpec((tr, N), lambda i: (i, 0)),
        ),
        compiler_params=pltpu.CompilerParams(
            dimension_semantics=("parallel",),
            vmem_limit_bytes=_VMEM_LIMIT_BYTES,
        ),
    )(*operands)
    return y.reshape(*lead, N)


# ---------------------------------------------------------------------------
# Flash-attention core: online softmax over KV tiles with per-tile causal mask.
# q/k/v layout: (B*H, T, Dh).  Scale 1/sqrt(Dh) is already folded into q.
# ---------------------------------------------------------------------------
def _flash_kernel(q_ref, k_ref, v_ref, o_ref, m_ref, l_ref, acc_ref,
                  *, block_q, block_k):
    qi = pl.program_id(1)
    ki = pl.program_id(2)
    n_k = pl.num_programs(2)

    @pl.when(ki == 0)
    def _init():
        m_ref[...] = jnp.full_like(m_ref, _NEG_INF)
        l_ref[...] = jnp.zeros_like(l_ref)
        acc_ref[...] = jnp.zeros_like(acc_ref)

    q_start = qi * block_q
    k_start = ki * block_k

    # Skip KV tiles that lie entirely above the causal diagonal (fully masked).
    @pl.when(k_start <= q_start + block_q - 1)
    def _compute():
        q = q_ref[...]                                            # (bq, Dh), pre-scaled
        k = k_ref[...]                                            # (bk, Dh)
        # Contract last dims directly (no materialized k.T); f32 MXU accumulate.
        s = jnp.einsum("qd,kd->qk", q, k,
                       preferred_element_type=jnp.float32)        # (bq, bk)

        row = q_start + lax.broadcasted_iota(jnp.int32, s.shape, 0)
        col = k_start + lax.broadcasted_iota(jnp.int32, s.shape, 1)
        s = jnp.where(col > row, _NEG_INF, s)

        m_prev = m_ref[...]
        m_new = jnp.maximum(m_prev, jnp.max(s, axis=-1, keepdims=True))
        alpha = jnp.exp(m_prev - m_new)
        p = jnp.exp(s - m_new)

        l_ref[...] = alpha * l_ref[...] + jnp.sum(p, axis=-1, keepdims=True)
        acc_ref[...] = alpha * acc_ref[...] + jnp.dot(
            p.astype(v_ref.dtype), v_ref[...], preferred_element_type=jnp.float32)
        m_ref[...] = m_new

    @pl.when(ki == n_k - 1)
    def _finalize():
        inv = pl.reciprocal(l_ref[...], approx=True)      # EUP vrcp, off the hot loop
        o_ref[...] = (acc_ref[...] * inv).astype(o_ref.dtype)


def _flash_attention(q, k, v, *, block_q=128, block_k=128):
    BH, T, Dh = q.shape
    bq = _pick_block(T, block_q)
    bk = _pick_block(T, block_k)
    grid = (BH, T // bq, T // bk)

    kernel = functools.partial(_flash_kernel, block_q=bq, block_k=bk)

    return pl.pallas_call(
        kernel,
        out_shape=jax.ShapeDtypeStruct((BH, T, Dh), q.dtype),
        grid_spec=pltpu.PrefetchScalarGridSpec(
            num_scalar_prefetch=0,
            grid=grid,
            in_specs=[
                pl.BlockSpec((None, bq, Dh), lambda b, qi, ki: (b, qi, 0)),
                pl.BlockSpec((None, bk, Dh), lambda b, qi, ki: (b, ki, 0)),
                pl.BlockSpec((None, bk, Dh), lambda b, qi, ki: (b, ki, 0)),
            ],
            out_specs=pl.BlockSpec((None, bq, Dh),
                                   lambda b, qi, ki: (b, qi, 0)),
            scratch_shapes=[
                pltpu.VMEM((bq, 1), jnp.float32),    # running max
                pltpu.VMEM((bq, 1), jnp.float32),    # running denom
                pltpu.VMEM((bq, Dh), jnp.float32),   # output accumulator
            ],
        ),
        compiler_params=pltpu.CompilerParams(
            dimension_semantics=("parallel", "parallel", "arbitrary"),
            vmem_limit_bytes=_VMEM_LIMIT_BYTES,
        ),
    )(q, k, v)


# ---------------------------------------------------------------------------
# Full module forward.
# ---------------------------------------------------------------------------
def multi_head_attention(x, wq, wk, wv, wo, bo, *, num_heads,
                         block_q=128, block_k=128, compute_dtype=None):
    """x: (B, T, d_in); wq/wk/wv: (d_in, d_out); wo: (d_out, d_out); bo: (d_out,).

    Weights are passed pre-transposed as (in, out) so y = x @ W matches nn.Linear.
    `compute_dtype=jnp.bfloat16` runs all MXU matmuls in bf16 (f32 accumulate,
    softmax math stays f32); default keeps the input dtype.
    """
    B, T, d_in = x.shape
    d_out = wq.shape[1]
    head_dim = d_out // num_heads
    out_dtype = x.dtype

    if compute_dtype is not None:
        x = x.astype(compute_dtype)
        wq, wk, wv, wo, bo = (a.astype(compute_dtype) for a in (wq, wk, wv, wo, bo))

    # Fold 1/sqrt(Dh) into the query weights (O(d_in*d_out) once) and fuse QKV.
    inv_sqrt_d = 1.0 / (head_dim ** 0.5)
    w_qkv = jnp.concatenate([wq * inv_sqrt_d, wk, wv], axis=1)   # (d_in, 3*d_out)

    qkv = _linear(x, w_qkv)                                      # (B, T, 3*d_out)
    q, k, v = jnp.split(qkv, 3, axis=-1)

    def to_heads(t):  # (B, T, d_out) -> (B*H, T, Dh)  (layout plumbing in XLA)
        return (t.reshape(B, T, num_heads, head_dim)
                 .transpose(0, 2, 1, 3)
                 .reshape(B * num_heads, T, head_dim))

    ctx = _flash_attention(to_heads(q), to_heads(k), to_heads(v),
                           block_q=block_q, block_k=block_k)     # (B*H, T, Dh)
    ctx = (ctx.reshape(B, num_heads, T, head_dim)
              .transpose(0, 2, 1, 3)
              .reshape(B, T, d_out))                             # (B, T, d_out)

    # Dropout p = 0.0 (eval) -> identity.
    out = _linear(ctx, wo, bias=bo)                              # (B, T, d_out)
    return out.astype(out_dtype)


def _reference(x, wq, wk, wv, wo, bo, *, num_heads):
    """Plain-JAX reference mirroring the PyTorch forward (dropout=0)."""
    B, T, d_in = x.shape
    d_out = wq.shape[1]
    head_dim = d_out // num_heads
    q = (x @ wq).reshape(B, T, num_heads, head_dim).transpose(0, 2, 1, 3)
    k = (x @ wk).reshape(B, T, num_heads, head_dim).transpose(0, 2, 1, 3)
    v = (x @ wv).reshape(B, T, num_heads, head_dim).transpose(0, 2, 1, 3)
    scores = jnp.einsum('bhtd,bhsd->bhts', q, k)
    mask = jnp.triu(jnp.ones((T, T), bool), k=1)
    scores = jnp.where(mask, -jnp.inf, scores)
    w = jax.nn.softmax(scores / head_dim ** 0.5, axis=-1)
    ctx = jnp.einsum('bhts,bhsd->bhtd', w, v).transpose(0, 2, 1, 3).reshape(B, T, d_out)
    return ctx @ wo + bo


if __name__ == "__main__":
    # Small shapes consistent with the module: batch=2, seq=8, d_in=32, d_out=32, heads=4.
    B, T, d_in, d_out, num_heads = 2, 8, 32, 32, 4

    key = jax.random.PRNGKey(0)
    kx, kq, kk, kv, ko, kb = jax.random.split(key, 6)
    x = jax.random.normal(kx, (B, T, d_in), dtype=jnp.float32)
    wq = jax.random.normal(kq, (d_in, d_out), dtype=jnp.float32) * 0.1
    wk = jax.random.normal(kk, (d_in, d_out), dtype=jnp.float32) * 0.1
    wv = jax.random.normal(kv, (d_in, d_out), dtype=jnp.float32) * 0.1
    wo = jax.random.normal(ko, (d_out, d_out), dtype=jnp.float32) * 0.1
    bo = jax.random.normal(kb, (d_out,), dtype=jnp.float32) * 0.1

    mha = jax.jit(functools.partial(multi_head_attention, num_heads=num_heads))
    out = jax.block_until_ready(mha(x, wq, wk, wv, wo, bo))

    ref = _reference(x, wq, wk, wv, wo, bo, num_heads=num_heads)
    assert out.shape == (B, T, d_out)
    # Tolerance allows for the EUP approximate reciprocal in the softmax finalize.
    assert jnp.allclose(out, ref, atol=5e-3, rtol=5e-3), "mismatch vs reference"

    print("KERNEL_OK")
</pallas_src>

<mosaic_0001>
module attributes {stable_mosaic.version = 11 : i64} {
  func.func @_linear_nobias_kernel(%arg0: i32, %arg1: memref<16x32xf32, #tpu.memory_space<vmem>>, %arg2: memref<32x96xf32, #tpu.memory_space<vmem>>, %arg3: memref<16x96xf32, #tpu.memory_space<vmem>>) attributes {dimension_semantics = [#tpu.dimension_semantics<parallel>], iteration_bounds = array<i64: 1>, scalar_prefetch = 0 : i64, scratch_operands = 0 : i64, tpu.core_type = #tpu.core_type<tc>, window_params = [{transform_indices = @transform_0, window_bounds = array<i64: 16, 32>}, {pipeline_mode = #tpu.pipeline_mode<synchronous>, transform_indices = @transform_1, window_bounds = array<i64: 32, 96>}, {transform_indices = @transform_2, window_bounds = array<i64: 16, 96>}]} {
    %c0 = arith.constant 0 : index
    %c0_0 = arith.constant 0 : index
    %0 = vector.load %arg1[%c0, %c0_0] : memref<16x32xf32, #tpu.memory_space<vmem>>, vector<16x32xf32>
    %c0_1 = arith.constant 0 : index
    %c0_2 = arith.constant 0 : index
    %1 = vector.load %arg2[%c0_1, %c0_2] : memref<32x96xf32, #tpu.memory_space<vmem>>, vector<32x96xf32>
    %cst = arith.constant dense<0.000000e+00> : vector<16x96xf32>
    %2 = tpu.matmul %0, %1, %cst {dimension_numbers = #tpu.dot_dimension_numbers<[1], [0], [0], [1], [0, 0, 1, 1], [], []>} : vector<16x32xf32>, vector<32x96xf32>, vector<16x96xf32> -> vector<16x96xf32>
    %c0_3 = arith.constant 0 : index
    %c0_4 = arith.constant 0 : index
    %3 = vector.load %arg3[%c0_3, %c0_4] : memref<16x96xf32, #tpu.memory_space<vmem>>, vector<16x96xf32>
    tpu.vector_store %arg3[%c0_3, %c0_4], %2 {strides = array<i32>} : memref<16x96xf32, #tpu.memory_space<vmem>>, vector<16x96xf32>,
    return
  }
  func.func @transform_0(%arg0: i32) -> (i32, i32) {
    %c0_i32 = arith.constant 0 : i32
    %c0_i32_0 = arith.constant 0 : i32
    return %arg0, %c0_i32 : i32, i32
  }
  func.func @transform_1(%arg0: i32) -> (i32, i32) {
    %c0_i32 = arith.constant 0 : i32
    %c0_i32_0 = arith.constant 0 : i32
    %c0_i32_1 = arith.constant 0 : i32
    return %c0_i32, %c0_i32_0 : i32, i32
  }
  func.func @transform_2(%arg0: i32) -> (i32, i32) {
    %c0_i32 = arith.constant 0 : i32
    %c0_i32_0 = arith.constant 0 : i32
    return %arg0, %c0_i32 : i32, i32
  }
}

module attributes {stable_mosaic.version = 11 : i64} {
  func.func @_linear_bias_kernel(%arg0: i32, %arg1: memref<16x32xf32, #tpu.memory_space<vmem>>, %arg2: memref<32x32xf32, #tpu.memory_space<vmem>>, %arg3: memref<1x32xf32, #tpu.memory_space<vmem>>, %arg4: memref<16x32xf32, #tpu.memory_space<vmem>>) attributes {dimension_semantics = [#tpu.dimension_semantics<parallel>], iteration_bounds = array<i64: 1>, scalar_prefetch = 0 : i64, scratch_operands = 0 : i64, tpu.core_type = #tpu.core_type<tc>, window_params = [{transform_indices = @transform_0, window_bounds = array<i64: 16, 32>}, {pipeline_mode = #tpu.pipeline_mode<synchronous>, transform_indices = @transform_1, window_bounds = array<i64: 32, 32>}, {pipeline_mode = #tpu.pipeline_mode<synchronous>, transform_indices = @transform_2, window_bounds = array<i64: 1, 32>}, {transform_indices = @transform_3, window_bounds = array<i64: 16, 32>}]} {
    %c0 = arith.constant 0 : index
    %c0_0 = arith.constant 0 : index
    %0 = vector.load %arg1[%c0, %c0_0] : memref<16x32xf32, #tpu.memory_space<vmem>>, vector<16x32xf32>
    %c0_1 = arith.constant 0 : index
    %c0_2 = arith.constant 0 : index
    %1 = vector.load %arg2[%c0_1, %c0_2] : memref<32x32xf32, #tpu.memory_space<vmem>>, vector<32x32xf32>
    %cst = arith.constant dense<0.000000e+00> : vector<16x32xf32>
    %2 = tpu.matmul %0, %1, %cst {dimension_numbers = #tpu.dot_dimension_numbers<[1], [0], [0], [1], [0, 0, 1, 1], [], []>} : vector<16x32xf32>, vector<32x32xf32>, vector<16x32xf32> -> vector<16x32xf32>
    %c0_3 = arith.constant 0 : index
    %c0_4 = arith.constant 0 : index
    %3 = vector.load %arg3[%c0_3, %c0_4] : memref<1x32xf32, #tpu.memory_space<vmem>>, vector<1x32xf32>
    %4 = vector.broadcast %3 : vector<1x32xf32> to vector<16x32xf32>
    %5 = arith.addf %2, %4 : vector<16x32xf32>
    %c0_5 = arith.constant 0 : index
    %c0_6 = arith.constant 0 : index
    %6 = vector.load %arg4[%c0_5, %c0_6] : memref<16x32xf32, #tpu.memory_space<vmem>>, vector<16x32xf32>
    tpu.vector_store %arg4[%c0_5, %c0_6], %5 {strides = array<i32>} : memref<16x32xf32, #tpu.memory_space<vmem>>, vector<16x32xf32>,
    return
  }
  func.func @transform_0(%arg0: i32) -> (i32, i32) {
    %c0_i32 = arith.constant 0 : i32
    %c0_i32_0 = arith.constant 0 : i32
    return %arg0, %c0_i32 : i32, i32
  }
  func.func @transform_1(%arg0: i32) -> (i32, i32) {
    %c0_i32 = arith.constant 0 : i32
    %c0_i32_0 = arith.constant 0 : i32
    %c0_i32_1 = arith.constant 0 : i32
    return %c0_i32, %c0_i32_0 : i32, i32
  }
  func.func @transform_2(%arg0: i32) -> (i32, i32) {
    %c0_i32 = arith.constant 0 : i32
    %c0_i32_0 = arith.constant 0 : i32
    %c0_i32_1 = arith.constant 0 : i32
    return %c0_i32, %c0_i32_0 : i32, i32
  }
  func.func @transform_3(%arg0: i32) -> (i32, i32) {
    %c0_i32 = arith.constant 0 : i32
    %c0_i32_0 = arith.constant 0 : i32
    return %arg0, %c0_i32 : i32, i32
  }
}

module attributes {stable_mosaic.version = 11 : i64} {
  func.func @_flash_kernel(%arg0: i32, %arg1: i32, %arg2: i32, %arg3: memref<1x8x8xf32, #tpu.memory_space<vmem>>, %arg4: memref<1x8x8xf32, #tpu.memory_space<vmem>>, %arg5: memref<1x8x8xf32, #tpu.memory_space<vmem>>, %arg6: memref<1x8x8xf32, #tpu.memory_space<vmem>>, %arg7: memref<8x1xf32, #tpu.memory_space<vmem>>, %arg8: memref<8x1xf32, #tpu.memory_space<vmem>>, %arg9: memref<8x8xf32, #tpu.memory_space<vmem>>) attributes {dimension_semantics = [#tpu.dimension_semantics<parallel>, #tpu.dimension_semantics<parallel>, #tpu.dimension_semantics<arbitrary>], iteration_bounds = array<i64: 8, 1, 1>, scalar_prefetch = 0 : i64, scratch_operands = 3 : i64, tpu.core_type = #tpu.core_type<tc>, window_params = [{transform_indices = @transform_0, window_bounds = array<i64: 1, 8, 8>}, {transform_indices = @transform_1, window_bounds = array<i64: 1, 8, 8>}, {transform_indices = @transform_2, window_bounds = array<i64: 1, 8, 8>}, {transform_indices = @transform_3, window_bounds = array<i64: 1, 8, 8>}]} {
    %c0_i32 = arith.constant 0 : i32
    %0 = arith.cmpi eq, %arg2, %c0_i32 : i32
    %1 = arith.extui %0 : i1 to i32
    %c0_i32_0 = arith.constant 0 : i32
    %2 = arith.cmpi ne, %1, %c0_i32_0 : i32
    scf.if %2 {
      %cst = arith.constant -1.000000e+30 : f32
      %13 = vector.broadcast %cst : f32 to vector<8x1xf32>
      %c0 = arith.constant 0 : index
      %c0_6 = arith.constant 0 : index
      %14 = vector.load %arg7[%c0, %c0_6] : memref<8x1xf32, #tpu.memory_space<vmem>>, vector<8x1xf32>
      tpu.vector_store %arg7[%c0, %c0_6], %13 {strides = array<i32>} : memref<8x1xf32, #tpu.memory_space<vmem>>, vector<8x1xf32>,
      %cst_7 = arith.constant 0.000000e+00 : f32
      %15 = vector.broadcast %cst_7 : f32 to vector<8x1xf32>
      %c0_8 = arith.constant 0 : index
      %c0_9 = arith.constant 0 : index
      %16 = vector.load %arg8[%c0_8, %c0_9] : memref<8x1xf32, #tpu.memory_space<vmem>>, vector<8x1xf32>
      tpu.vector_store %arg8[%c0_8, %c0_9], %15 {strides = array<i32>} : memref<8x1xf32, #tpu.memory_space<vmem>>, vector<8x1xf32>,
      %cst_10 = arith.constant 0.000000e+00 : f32
      %17 = vector.broadcast %cst_10 : f32 to vector<8x8xf32>
      %c0_11 = arith.constant 0 : index
      %c0_12 = arith.constant 0 : index
      %18 = vector.load %arg9[%c0_11, %c0_12] : memref<8x8xf32, #tpu.memory_space<vmem>>, vector<8x8xf32>
      tpu.vector_store %arg9[%c0_11, %c0_12], %17 {strides = array<i32>} : memref<8x8xf32, #tpu.memory_space<vmem>>, vector<8x8xf32>,
    } else {
    }
    %c8_i32 = arith.constant 8 : i32
    %3 = arith.muli %arg1, %c8_i32 : i32
    %c8_i32_1 = arith.constant 8 : i32
    %4 = arith.muli %arg2, %c8_i32_1 : i32
    %c8_i32_2 = arith.constant 8 : i32
    %5 = arith.addi %3, %c8_i32_2 : i32
    %c1_i32 = arith.constant 1 : i32
    %6 = arith.subi %5, %c1_i32 : i32
    %7 = arith.cmpi sle, %4, %6 : i32
    %8 = arith.extui %7 : i1 to i32
    %c0_i32_3 = arith.constant 0 : i32
    %9 = arith.cmpi ne, %8, %c0_i32_3 : i32
    scf.if %9 {
      %c0 = arith.constant 0 : index
      %c0_6 = arith.constant 0 : index
      %c0_7 = arith.constant 0 : index
      %13 = vector.load %arg3[%c0, %c0_6, %c0_7] : memref<1x8x8xf32, #tpu.memory_space<vmem>>, vector<1x8x8xf32>
      %14 = vector.shape_cast %13 : vector<1x8x8xf32> to vector<8x8xf32>
      %c0_8 = arith.constant 0 : index
      %c0_9 = arith.constant 0 : index
      %c0_10 = arith.constant 0 : index
      %15 = vector.load %arg4[%c0_8, %c0_9, %c0_10] : memref<1x8x8xf32, #tpu.memory_space<vmem>>, vector<1x8x8xf32>
      %16 = vector.shape_cast %15 : vector<1x8x8xf32> to vector<8x8xf32>
      "tpu.trace_start"() <{level = 10 : i32, message = "qd,kd->qk"}> : () -> ()
      %cst = arith.constant dense<0.000000e+00> : vector<8x8xf32>
      %17 = tpu.matmul %14, %16, %cst {dimension_numbers = #tpu.dot_dimension_numbers<[1], [1], [0], [0], [0, 0, 1, 0], [], []>} : vector<8x8xf32>, vector<8x8xf32>, vector<8x8xf32> -> vector<8x8xf32>
      "tpu.trace_stop"() : () -> ()
      %18 = tpu.iota {dimensions = array<i32: 0>} : vector<8x8xi32>
      %19 = vector.broadcast %3 : i32 to vector<8x8xi32>
      %20 = arith.addi %19, %18 : vector<8x8xi32>
      %21 = tpu.iota {dimensions = array<i32: 1>} : vector<8x8xi32>
      %22 = vector.broadcast %4 : i32 to vector<8x8xi32>
      %23 = arith.addi %22, %21 : vector<8x8xi32>
      %24 = arith.cmpi sgt, %23, %20 : vector<8x8xi32>
      %cst_11 = arith.constant -1.000000e+30 : f32
      %25 = vector.broadcast %cst_11 : f32 to vector<8x8xf32>
      %26 = arith.select %24, %25, %17 : vector<8x8xi1>, vector<8x8xf32>
      %c0_12 = arith.constant 0 : index
      %c0_13 = arith.constant 0 : index
      %27 = vector.load %arg7[%c0_12, %c0_13] : memref<8x1xf32, #tpu.memory_space<vmem>>, vector<8x1xf32>
      %cst_14 = arith.constant dense<0xFF800000> : vector<8xf32>
      %28 = vector.multi_reduction <maximumf>, %26, %cst_14 [1] : vector<8x8xf32> to vector<8xf32>
      %29 = vector.shape_cast %28 : vector<8xf32> to vector<8x1xf32>
      %30 = arith.maximumf %27, %29 : vector<8x1xf32>
      %31 = arith.subf %27, %30 : vector<8x1xf32>
      %32 = math.exp %31 : vector<8x1xf32>
      %33 = vector.broadcast %30 : vector<8x1xf32> to vector<8x8xf32>
      %34 = arith.subf %26, %33 : vector<8x8xf32>
      %35 = math.exp %34 : vector<8x8xf32>
      %c0_15 = arith.constant 0 : index
      %c0_16 = arith.constant 0 : index
      %36 = vector.load %arg8[%c0_15, %c0_16] : memref<8x1xf32, #tpu.memory_space<vmem>>, vector<8x1xf32>
      %37 = arith.mulf %32, %36 : vector<8x1xf32>
      %cst_17 = arith.constant dense<0.000000e+00> : vector<8xf32>
      %38 = vector.multi_reduction <add>, %35, %cst_17 [1] : vector<8x8xf32> to vector<8xf32>
      %39 = vector.shape_cast %38 : vector<8xf32> to vector<8x1xf32>
      %40 = arith.addf %37, %39 : vector<8x1xf32>
      %c0_18 = arith.constant 0 : index
      %c0_19 = arith.constant 0 : index
      %41 = vector.load %arg8[%c0_18, %c0_19] : memref<8x1xf32, #tpu.memory_space<vmem>>, vector<8x1xf32>
      tpu.vector_store %arg8[%c0_18, %c0_19], %40 {strides = array<i32>} : memref<8x1xf32, #tpu.memory_space<vmem>>, vector<8x1xf32>,
      %c0_20 = arith.constant 0 : index
      %c0_21 = arith.constant 0 : index
      %42 = vector.load %arg9[%c0_20, %c0_21] : memref<8x8xf32, #tpu.memory_space<vmem>>, vector<8x8xf32>
      %43 = vector.broadcast %32 : vector<8x1xf32> to vector<8x8xf32>
      %44 = arith.mulf %43, %42 : vector<8x8xf32>
      %c0_22 = arith.constant 0 : index
      %c0_23 = arith.constant 0 : index
      %c0_24 = arith.constant 0 : index
      %45 = vector.load %arg5[%c0_22, %c0_23, %c0_24] : memref<1x8x8xf32, #tpu.memory_space<vmem>>, vector<1x8x8xf32>
      %46 = vector.shape_cast %45 : vector<1x8x8xf32> to vector<8x8xf32>
      %cst_25 = arith.constant dense<0.000000e+00> : vector<8x8xf32>
      %47 = tpu.matmul %35, %46, %cst_25 {dimension_numbers = #tpu.dot_dimension_numbers<[1], [0], [0], [1], [0, 0, 1, 1], [], []>} : vector<8x8xf32>, vector<8x8xf32>, vector<8x8xf32> -> vector<8x8xf32>
      %48 = arith.addf %44, %47 : vector<8x8xf32>
      %c0_26 = arith.constant 0 : index
      %c0_27 = arith.constant 0 : index
      %49 = vector.load %arg9[%c0_26, %c0_27] : memref<8x8xf32, #tpu.memory_space<vmem>>, vector<8x8xf32>
      tpu.vector_store %arg9[%c0_26, %c0_27], %48 {strides = array<i32>} : memref<8x8xf32, #tpu.memory_space<vmem>>, vector<8x8xf32>,
      %c0_28 = arith.constant 0 : index
      %c0_29 = arith.constant 0 : index
      %50 = vector.load %arg7[%c0_28, %c0_29] : memref<8x1xf32, #tpu.memory_space<vmem>>, vector<8x1xf32>
      tpu.vector_store %arg7[%c0_28, %c0_29], %30 {strides = array<i32>} : memref<8x1xf32, #tpu.memory_space<vmem>>, vector<8x1xf32>,
    } else {
    }
    %c0_i32_4 = arith.constant 0 : i32
    %10 = arith.cmpi eq, %arg2, %c0_i32_4 : i32
    %11 = arith.extui %10 : i1 to i32
    %c0_i32_5 = arith.constant 0 : i32
    %12 = arith.cmpi ne, %11, %c0_i32_5 : i32
    scf.if %12 {
      %c0 = arith.constant 0 : index
      %c0_6 = arith.constant 0 : index
      %13 = vector.load %arg8[%c0, %c0_6] : memref<8x1xf32, #tpu.memory_space<vmem>>, vector<8x1xf32>
      %14 = tpu.reciprocal %13 {approx = true} : vector<8x1xf32> -> vector<8x1xf32>
      %c0_7 = arith.constant 0 : index
      %c0_8 = arith.constant 0 : index
      %15 = vector.load %arg9[%c0_7, %c0_8] : memref<8x8xf32, #tpu.memory_space<vmem>>, vector<8x8xf32>
      %16 = vector.broadcast %14 : vector<8x1xf32> to vector<8x8xf32>
      %17 = arith.mulf %15, %16 : vector<8x8xf32>
      %c0_9 = arith.constant 0 : index
      %c0_10 = arith.constant 0 : index
      %c0_11 = arith.constant 0 : index
      %18 = vector.load %arg6[%c0_9, %c0_10, %c0_11] : memref<1x8x8xf32, #tpu.memory_space<vmem>>, vector<1x8x8xf32>
      %19 = vector.shape_cast %18 : vector<1x8x8xf32> to vector<8x8xf32>
      %20 = vector.shape_cast %17 : vector<8x8xf32> to vector<1x8x8xf32>
      tpu.vector_store %arg6[%c0_9, %c0_10, %c0_11], %20 {strides = array<i32>} : memref<1x8x8xf32, #tpu.memory_space<vmem>>, vector<1x8x8xf32>,
    } else {
    }
    return
  }
  func.func @transform_0(%arg0: i32, %arg1: i32, %arg2: i32) -> (i32, i32, i32) {
    %c0_i32 = arith.constant 0 : i32
    %c0_i32_0 = arith.constant 0 : i32
    return %arg0, %arg1, %c0_i32 : i32, i32, i32
  }
  func.func @transform_1(%arg0: i32, %arg1: i32, %arg2: i32) -> (i32, i32, i32) {
    %c0_i32 = arith.constant 0 : i32
    %c0_i32_0 = arith.constant 0 : i32
    return %arg0, %arg2, %c0_i32 : i32, i32, i32
  }
  func.func @transform_2(%arg0: i32, %arg1: i32, %arg2: i32) -> (i32, i32, i32) {
    %c0_i32 = arith.constant 0 : i32
    %c0_i32_0 = arith.constant 0 : i32
    return %arg0, %arg2, %c0_i32 : i32, i32, i32
  }
  func.func @transform_3(%arg0: i32, %arg1: i32, %arg2: i32) -> (i32, i32, i32) {
    %c0_i32 = arith.constant 0 : i32
    %c0_i32_0 = arith.constant 0 : i32
    return %arg0, %arg1, %c0_i32 : i32, i32, i32
  }
}

</mosaic_0001>

<bundles_post_ra>
// kernel: multi_head_attention.3
= control target key start
LH: loop header
LB: loop body
LE: loop exit
PB: predicated region body
PF: predicated region fallthrough
CT: control target
= control target key end

     0   :  { %vm17_vm0 = vcmask 261120   ;;  %vm99_vm1 = vcmask 785408   ;;  %s166_s1 = inlined_call_operand.vmem [shape: f32[32,96], index: 1, kind: input, shape index: {}]   ;;  %s167_s0 = inlined_call_operand.vmem [shape: f32[16,32], index: 0, kind: input, shape index: {}]   ;;  %s168_s2 = inlined_call_operand.vmem [shape: f32[16,96], index: 2, kind: output, shape index: {}]  }
   0x1   :  { %v16_v0 = vld [vmem:[%s166_s1 + $0x18] sm:$0xff]  ;;  %v15_v1 = vld [vmem:[%s166_s1 + $0x10] sm:$0xff]  ;;  %v11_v2 = vld [vmem:[%s167_s0] sm:$0xff] }
   0x2   :  { %114 = vmatprep.subr.mxu0 %v16_v0  ;;  %v14_v3 = vld [vmem:[%s166_s1 + $0x8] sm:$0xff]  ;;  %122 = vmatprep.mubr.msk.f32.mxu0 %vm17_vm0, %v11_v2  ;;  %v13_v4 = vld [vmem:[%s166_s1] sm:$0xff] }
   0x3   :  { %115 = vmatpush3.msra.mxu0 %v16_v0  ;;  %v12_v5 = vld [vmem:[%s167_s0 + $0x8] sm:$0xff] }
   0x4   :  { %116 = vmatprep.subr.mxu0 %v15_v1 }
   0x5   :  { %117 = vmatpush3.msra.mxu0 %v15_v1 }
   0x6   :  { %118 = vmatprep.subr.mxu0 %v14_v3 }
   0x7   :  { %119 = vmatpush3.msra.mxu0 %v14_v3 }
   0x8   :  { %120 = vmatprep.subr.mxu0 %v13_v4 }
   0x9   :  { %121 = vmatpush3.msra.mxu0 %v13_v4 }
   0xa   :  { %123 = vmatmul.mubr.msk.f32.vlgmr.msra.gmra.mxu0 %vm17_vm0, %v12_v5 }
  0xca   :  { %v124_v6 = vpop.f32.mrf.mxu0 }
  0xcb   :  { %101 = vst.msk [vmem:[%s168_s2 + $0x8] sm:$0xff] %vm99_vm1, %v124_v6 }
  0xcc   :  { %v90_v7 = vpop.f32.mrf.mxu0 }
  0xcd   :  { %100 = vst.msk [vmem:[%s168_s2] sm:$0xff] %vm99_vm1, %v90_v7 }

// kernel: multi_head_attention.5
= control target key start
LH: loop header
LB: loop body
LE: loop exit
PB: predicated region body
PF: predicated region fallthrough
CT: control target
= control target key end

     0   :  { %vm28_vm0 = vcmask 261120   ;;  %s224_s0 = inlined_call_operand.vmem [shape: f32[16,32], index: 0, kind: input, shape index: {}]   ;;  %s225_s1 = inlined_call_operand.vmem [shape: f32[32,32], index: 1, kind: input, shape index: {}]   ;;  %s226_s2 = inlined_call_operand.vmem [shape: f32[1,32], index: 2, kind: input, shape index: {}]   ;;  %s227_s3 = inlined_call_operand.hbm [shape: f32[16,32], index: 3, kind: output, shape index: {}]  }
   0x1   :  { %v20_v0 = vld [vmem:[%s225_s1 + $0x18] sm:$0xff]  ;;  %v19_v1 = vld [vmem:[%s225_s1 + $0x10] sm:$0xff]  ;;  %v15_v2 = vld [vmem:[%s224_s0] sm:$0xff] }
   0x2   :  { %137 = vmatprep.subr.mxu0 %v20_v0  ;;  %v18_v3 = vld [vmem:[%s225_s1 + $0x8] sm:$0xff]  ;;  %145 = vmatprep.mubr.msk.f32.mxu0 %vm28_vm0, %v15_v2 }
   0x3   :  { %138 = vmatpush3.msra.mxu0 %v20_v0 }
   0x4   :  { %8 = vsyncpa [#allocation3], 0  ;;  %139 = vmatprep.subr.mxu0 %v19_v1  ;;  %v17_v4 = vld [vmem:[%s225_s1] sm:$0xff]  ;;  %v16_v5 = vld [vmem:[%s224_s0 + $0x8] sm:$0xff]  ;;  %s173_s26 = smov [#allocation2]  }
   0x5   :  { %140 = vmatpush3.msra.mxu0 %v19_v1  ;;  %v128_v6 = vld [vmem:[%s226_s2] ss:$0 sm:$0xff]  ;;  %s117_s27 = sshll.u32 %s173_s26, 4  ;;  %s118_s27 = int_to_ptr.vmem [resolvable:$true] %s117_s27 }
   0x6   :  { %141 = vmatprep.subr.mxu0 %v18_v3  ;;  %s151_s0 = scalar_lea.vmem %s118_s27, 256  ;;  %p156_p1 = scmp.lt.s32.totalorder %s118_s27, %s118_s27 }
   0x7   :  { %142 = vmatpush3.msra.mxu0 %v18_v3  ;;  %p152_p0 = scmp.ne.s32.totalorder %s118_s27, %s151_s0  ;;  %p157_p2 = scmp.lt.s32.totalorder %s151_s0, %s151_s0 }
   0x8   :  { %143 = vmatprep.subr.mxu0 %v17_v4 }
   0x9   :  { %144 = vmatpush3.msra.mxu0 %v17_v4  ;;  %p158_p3 = por %p157_p2, %p156_p1 }
   0xa   :  { %146 = vmatmul.mubr.msk.f32.vlgmr.msra.gmra.mxu0 %vm28_vm0, %v16_v5 }
   0xb   :  { %p159_p4 = pnand %p158_p3, %p152_p0 }
  0xca   :  { %v147_v7 = vpop.f32.mrf.mxu0 }
  0xcb   :  { %v107_v8 = vadd.f32 %v147_v7, %v128_v6 }
  0xcc   :  { %v101_v9 = vpop.f32.mrf.mxu0 }
  0xcd   :  { %111 = vst.msk [vmem:[#allocation2 + $0x8] sm:$0xff] %vm28_vm0, %v107_v8  ;;  %v102_v10 = vadd.f32 %v128_v6, %v101_v9 }
  0xcf   :  { %110 = vst.msk [vmem:[#allocation2] sm:$0xff] %vm28_vm0, %v102_v10 }
  0xd0   :  { %162 = shalt.err (!%p159_p4)
}
  0xd1   :  { %s174_s1 = smov 128   ;;  %s175_s2 = smov 8  }
  0xd2   :  { %123 = dma.vmem_to_hbm [thread:$0]  %s118_s27, 256, %s227_s3, [#allocation3], %s174_s1, %s174_s1, %s175_s2  }
  0xd3   :  { %171 = dma.done.wait [#allocation3], 256  }
  0xd4   :  { %172 = vsyncadd [#allocation3], 4294967040 }
  0xd5   :  { %127 = vsyncpa [#allocation3], 1 }

// kernel: multi_head_attention.4
= control target key start
LH: loop header
LB: loop body
LE: loop exit
PB: predicated region body
PF: predicated region fallthrough
CT: control target
= control target key end

     0   :  { %s706_s12 = smov 0   ;;  %s708_s13 = smov 0   ;;  %s763_s0 = inlined_call_operand.vmem [shape: f32[8,8,8], index: 0, kind: input, shape index: {}]   ;;  %s764_s1 = inlined_call_operand.vmem [shape: f32[8,8,8], index: 1, kind: input, shape index: {}]   ;;  %s765_s2 = inlined_call_operand.vmem [shape: f32[8,8,8], index: 2, kind: input, shape index: {}]   ;;  %s766_s3 = inlined_call_operand.vmem [shape: f32[8,8,8], index: 3, kind: output, shape index: {}]  }
   0x1   :  { %s710_s14 = smov 0  }
   0x2 LB: > { %s32_s15 = sadd.s32 1, %s676_s13  ;;  %p598_p0 = scmp.ge.s32.totalorder %s680_s14, 1  ;;  %s680_s14 = sphi %s710_s14, %s13_s14   ;;  %s676_s13 = sphi %s708_s13, %s768_s13   ;;  %s672_s12 = sphi %s706_s12, %s767_s12  }
   0x3   : > { %p34_p1 = scmp.ge.s32.totalorder %s32_s15, 8  ;;  %p190_p2 = scmp.lt.s32.totalorder %s680_s14, 9 }
   0x5   : > { %s770_s15 = smov (%p34_p1, %s32_s15), 0  ;;  %p191_p3 = pnand %p598_p0, %p190_p2 }
   0x6   : > { %p232_p4 = scmp.lt.s32.totalorder (!%p191_p3), %s672_s12, 7 }
   0x7   : > { %194 = sbr.rel (%p191_p3) target bundleno = 786 (0x312), region = 32 }
   0xc   : > { %vm267_vm0 = vcmask 64512   ;;  %v682_v0 = vmov 0.0   ;;  %vm683_vm1 = vmmov 0   ;;  %s772_s12 = smov (!%p232_p4, %s672_s12), 7  ;;  %vm264_vm2 = vcmask 7168  }
   0xd   : > { %612 = vmatprep.subr.mxu0 %v682_v0  ;;  %268 = vst.msk [vmem:[#allocation4] sm:$0xff] %vm267_vm0, %v682_v0  ;;  %614 = vmatprep.mubr.msk.f32.mxu0 %vm683_vm1, %v682_v0  ;;  %s725_s16 = sshll.u32 %s772_s12, 3  ;;  %v684_v3 = vmov -1e+30   ;;  %v355_v4 = vlaneseq  ;;  %v685_v11 = vmov 0  }
   0xe   : > { %617 = vmatprep.subr.mxu1 %v682_v0  ;;  %619 = vmatprep.mubr.msk.f32.mxu1 %vm683_vm1, %v682_v0  ;;  %s245_s19 = scalar_lea.vmem %s764_s1, %s725_s16  ;;  %s238_s22 = scalar_lea.vmem %s763_s0, %s725_s16  ;;  %265 = vst.msk [vmem:[#allocation2] sm:$0xff] %vm264_vm2, %v684_v3  ;;  %266 = vst.msk [vmem:[#allocation3] sm:$0xff] %vm264_vm2, %v682_v0 }
   0xf   : > { %v277_v1 = vld [vmem:[%s245_s19] sm:$0xff]  ;;  %v356_v5 = vshrl.u32 %v355_v4, 7  ;;  %v360_v6 = vand.u32 127, %v355_v4  ;;  %650 = vset.pattern.permute.xlu0 %v685_v11  ;;  %651 = vset.pattern.permute.xlu1 %v685_v11  ;;  %s252_s25 = scalar_lea.vmem %s765_s2, %s725_s16  ;;  %s259_s28 = scalar_lea.vmem %s766_s3, %s725_s16 }
  0x10   : > { %613 = vmatpush3.xpose.msk.msra.mxu0 %vm267_vm0, %v277_v1  ;;  %v276_v2 = vld [vmem:[%s238_s22] sm:$0xff] }
  0x11   : > { %vm363_vm3 = vcmp.gt.s32.totalorder %v360_v6, %v356_v5  ;;  %v396_v16 = vld [vmem:[%s252_s25] sm:$0xff] }
  0x12   : > { %618 = vmatpush3.msra.mxu1 %v396_v16 }
  0x13   : > { %615 = vmatmul.mubr.msk.f32.vlgmr.msra.gmra.mxu0 %vm267_vm0, %v276_v2 }
  0x14   : > { %v389_v30 = vld [vmem:[#allocation4] sm:$0xff] }
  0x15   : > { %v365_v12 = vld [vmem:[#allocation2] sm:$0xff]  ;;  %v381_v24 = vld [vmem:[#allocation3] sm:$0xff] }
  0xd3   : > { %v351_v7 = vpop.f32.mrf.mxu0 }
  0xd4   : > { %v364_v8 = vsel %vm363_vm3, -1e+30, %v351_v7 }
  0xd5   : > { %v616_v9 = vpop.f32.mrf.mxu0  ;;  %v366_v10 = vsel %vm267_vm0, %v364_v8, -inf }
  0xd6   : > { %367 = vmax.xlane.f32.xlu0 %v366_v10 }
 0x15f   : > { %v368_v13 = vpop.xlane.xlu0 %367 }
 0x160   : > { %v369_v14 = vmax.f32 %v365_v12, %v368_v13 }
 0x162   : > { %v370_v15 = vsub.f32 %v365_v12, %v369_v14  ;;  %472 = vst.msk [vmem:[#allocation2] sm:$0xff] %vm264_vm2, %v369_v14  ;;  %375 = vperm.xlu0 %650, %v369_v14  }
 0x164   : > { %v371_v21 = vmul.f32 1.442695, %v370_v15 }
 0x1dd   : > { %v376_v17 = vpop.permute.xlu0 %375 }
 0x1de   : > { %v378_v18 = vsub.f32 %v364_v8, %v376_v17 }
 0x1e0   : > { %v379_v19 = vmul.f32 1.442695, %v378_v18 }
 0x1e2   : > { %652 = vpow2.f32 %v379_v19 }
 0x1e3   : > { %654 = vpow2.f32 %v371_v21 }
 0x1ef   : > { %v653_v20 = vpop.eup %652 }
 0x1f0   : > { %620 = vmatmul.mubr.msk.f32.vlgmr.msra.gmra.mxu1 %vm267_vm0, %v653_v20  ;;  %v383_v22 = vsel %vm267_vm0, %v653_v20, 0.0  ;;  %v655_v23 = vpop.eup %654 }
 0x1f1   : > { %384 = vadd.xlane.f32.xlu1 %v383_v22  ;;  %v382_v25 = vmul.f32 %v655_v23, %v381_v24 }
 0x202   : > { %392 = vperm.xlu1 %651, %v655_v23  }
 0x27a   : > { %v385_v26 = vpop.xlane.xlu1 %384 }
 0x27b   : > { %v386_v27 = vadd.f32 %v385_v26, %v382_v25 }
 0x27d   : > { %388 = vst.msk [vmem:[#allocation3] sm:$0xff] %vm264_vm2, %v386_v27 }
 0x27e   : > { %v393_v31 = vpop.permute.xlu1 %392 }
 0x27f   : > { %v395_v32 = vmul.f32 %v393_v31, %v389_v30 }
 0x284   : > { %v476_v28 = vld [vmem:[#allocation3] sm:$0xff] }
 0x285   : > { %656 = vrcp.f32 %v476_v28 }
 0x292   : > { %v657_v29 = vpop.eup %656 }
 0x293   : > { %481 = vperm.xlu1 %651, %v657_v29  }
 0x2b0   : > { %v466_v33 = vpop.f32.mrf.mxu1 }
 0x2b1   : > { %v470_v34 = vadd.f32 %v466_v33, %v395_v32 }
 0x2b2   : > { %v621_v35 = vpop.f32.mrf.mxu1 }
 0x2b3   : > { %471 = vst.msk [vmem:[#allocation4] sm:$0xff] %vm267_vm0, %v470_v34 }
 0x2ba   : > { %v478_v36 = vld [vmem:[#allocation4] sm:$0xff] }
 0x30e   : > { %v482_v37 = vpop.permute.xlu1 %481 }
 0x30f   : > { %v484_v38 = vmul.f32 %v482_v37, %v478_v36 }
 0x311   : > { %486 = vst.msk [vmem:[%s259_s28] sm:$0xff] %vm267_vm0, %v484_v38 }
 0x312 PF: > { %s13_s14 = sadd.s32 1, %s680_s14   ;;  %s767_s12 = smov %s676_s13 }
 0x313   : > { %p10_p5 = scmp.ge.s32.totalorder %s13_s14, 10   ;;  %s768_s13 = smov %s770_s15 }
 0x315   :  { %12 = sbr.rel (!%p10_p5) target bundleno = 2 (0x2), region = 80 }

</bundles_post_ra>
